<compile_context>
chip_gen: v6e
topology: v6e:2x2x1
jax: 0.10.0
libtpu: 0.0.40
codegen_flags: <defaults>
</compile_context>

<pallas_src>
import jax
import jax.numpy as jnp
from jax.experimental import pallas as pl
from jax.experimental.pallas import tpu as pltpu

LN_EPS = 1e-5


def _round_up(x, m):
    return ((x + m - 1) // m) * m


def _vmem_budget_and_limit():
    """Pick a tile-sizing budget and scoped-VMEM limit for this TPU generation."""
    cap = 0
    try:
        cap = int(getattr(pltpu.get_tpu_info(), "vmem_capacity_bytes", 0))
    except Exception:
        cap = 0
    if cap >= 100 * 1024 * 1024:          # 128 MiB parts (v5e / v6e)
        return 96 * 1024 * 1024, 110 * 1024 * 1024
    # 64 MiB parts (v7x) or unknown -> conservative.
    return 40 * 1024 * 1024, 48 * 1024 * 1024


def _ln_proj_kernel(x_ref, w_ref, b_ref, o_ref):
    # x_ref: (tm, C2)      activation rows, C2 = 2*embed_dim
    # w_ref: (C2, E_out)   gamma-folded projection weight ([in, out] layout)
    # b_ref: (1,  E_out)   beta-folded bias (f32)
    # o_ref: (tm, E_out)
    x = x_ref[...].astype(jnp.float32)
    inv_c2 = 1.0 / x.shape[-1]
    # One-pass LN statistics in f32: var = E[x^2] - mean^2.
    s1 = jnp.sum(x, axis=-1, keepdims=True)
    s2 = jnp.sum(x * x, axis=-1, keepdims=True)
    mean = s1 * inv_c2
    var = jnp.maximum(s2 * inv_c2 - mean * mean, 0.0)
    xhat = (x - mean) * jax.lax.rsqrt(var + LN_EPS)
    # Matmul in the weight's native dtype (bf16 weights -> native MXU path).
    acc = jnp.dot(xhat.astype(w_ref.dtype), w_ref[...],
                  preferred_element_type=jnp.float32)
    o_ref[...] = (acc + b_ref[...]).astype(o_ref.dtype)


def _ln_proj(x_flat, w_fold, bias, *, tm, e_out, vmem_limit):
    M, C2 = x_flat.shape
    grid = (pl.cdiv(M, tm),)   # ragged last block: OOB output stores are masked
    return pl.pallas_call(
        _ln_proj_kernel,
        out_shape=jax.ShapeDtypeStruct((M, e_out), x_flat.dtype),
        grid_spec=pltpu.PrefetchScalarGridSpec(
            num_scalar_prefetch=0,
            grid=grid,
            in_specs=[
                pl.BlockSpec((tm, C2), lambda i: (i, 0)),
                pl.BlockSpec((C2, e_out), lambda i: (0, 0)),
                pl.BlockSpec((1, e_out), lambda i: (0, 0)),
            ],
            out_specs=pl.BlockSpec((tm, e_out), lambda i: (i, 0)),
        ),
        compiler_params=pltpu.CompilerParams(
            dimension_semantics=("parallel",),   # shards rows across v7x's 2 TCs
            vmem_limit_bytes=vmem_limit,
        ),
    )(x_flat, w_fold, bias)


def patch_merging(x_nchw, gamma, beta, weight, *, tm=512):
    """Forward of PatchMerging.

    x_nchw: [N, C, H, W] with 4*C == 2*embed_dim.
    gamma/beta: LayerNorm(2*embed_dim) affine params.
    weight: [embed_dim, 2*embed_dim]  (PyTorch nn.Linear convention [out, in]).
    Returns (out [N, L, embed_dim], h, w) with h = H//2, w = W//2, L = h*w.
    """
    N, C, H, W = x_nchw.shape
    assert H % 2 == 0 and W % 2 == 0
    h, w = H // 2, W // 2
    C2 = 4 * C                     # == 2 * embed_dim
    E = weight.shape[0]            # embed_dim
    M = N * h * w

    # Fused 2x2 space-to-depth + NCHW->NLC in ONE transpose pass:
    # axes (N, C, i, di, j, dj) -> (N, i, j, dj, di, C). The PyTorch concat
    # order x0(di=0,dj=0), x1(1,0), x2(0,1), x3(1,1) is dj-major, di, C fastest,
    # which matches this flatten.
    x6 = x_nchw.reshape(N, C, h, 2, w, 2)
    x_flat = jnp.transpose(x6, (0, 2, 4, 5, 3, 1)).reshape(M, C2)

    # Fold the LayerNorm affine into the projection:
    #   out = (xhat*gamma + beta) @ W^T = xhat @ (gamma[:,None]*W^T) + beta @ W^T
    w_t_f32 = jnp.transpose(weight).astype(jnp.float32)         # (C2, E)
    gamma_col = gamma.astype(jnp.float32).reshape(C2, 1)
    beta_row = beta.astype(jnp.float32).reshape(1, C2)
    w_fold = (gamma_col * w_t_f32).astype(weight.dtype)          # (C2, E)
    bias = beta_row @ w_t_f32                                    # (1, E), f32

    # Output lane width: pad to 128 only when E < 128 (lane-dense stores are
    # worth the later narrow column slice); for E >= 128 write true E and take
    # the (small) masked-tail store instead of a full extra output HBM pass.
    if E < 128:
        E_out = 128
        w_fold = jnp.pad(w_fold, ((0, 0), (0, E_out - E)))
        bias = jnp.pad(bias, ((0, 0), (0, E_out - E)))
        slice_cols = True
    else:
        E_out = E
        slice_cols = False

    # Row tile: as large as requested, clamped to M and to the per-generation
    # VMEM budget (double-buffered I/O tiles + resident weight + in-kernel f32
    # temporaries: xhat, cast matmul operand, f32 accumulator).
    budget, vmem_limit = _vmem_budget_and_limit()
    x_bytes = x_flat.dtype.itemsize
    w_bytes = w_fold.dtype.itemsize
    tm_eff = min(_round_up(max(tm, 8), 8), _round_up(M, 8))
    while tm_eff > 8:
        est = (2 * tm_eff * C2 * x_bytes          # input tiles (double-buffered)
               + 2 * tm_eff * E_out * x_bytes     # output tiles (double-buffered)
               + tm_eff * C2 * (4 + w_bytes)      # f32 xhat + cast matmul operand
               + tm_eff * E_out * 4               # f32 accumulator
               + 2 * C2 * E_out * w_bytes         # resident weight (double-buffered)
               + 4 * E_out * 4)                   # bias
        if est <= budget:
            break
        tm_eff = max(8, _round_up(tm_eff // 2, 8))

    # Guarantee >= 2 grid steps whenever possible so both v7x cores get work.
    if tm_eff >= M and M > 8:
        tm_eff = max(8, _round_up((M + 1) // 2, 8))

    out_flat = _ln_proj(x_flat, w_fold, bias, tm=tm_eff, e_out=E_out,
                        vmem_limit=vmem_limit)
    if slice_cols:
        out_flat = out_flat[:, :E]
    out = out_flat.reshape(N, h * w, E)
    return out, h, w


def _reference(x_nchw, gamma, beta, weight):
    N, C, H, W = x_nchw.shape
    x0 = x_nchw[..., 0::2, 0::2]
    x1 = x_nchw[..., 1::2, 0::2]
    x2 = x_nchw[..., 0::2, 1::2]
    x3 = x_nchw[..., 1::2, 1::2]
    xc = jnp.concatenate([x0, x1, x2, x3], axis=1)
    h, w = xc.shape[2], xc.shape[3]
    x = jnp.transpose(xc.reshape(N, 4 * C, h * w), (0, 2, 1)).astype(jnp.float32)
    mean = jnp.mean(x, axis=-1, keepdims=True)
    var = jnp.mean((x - mean) ** 2, axis=-1, keepdims=True)
    xhat = (x - mean) * jax.lax.rsqrt(var + LN_EPS)
    y = xhat * gamma + beta
    return jnp.einsum("nlc,ec->nle", y, weight.astype(jnp.float32)), h, w


if __name__ == "__main__":
    key = jax.random.PRNGKey(0)
    k1, k2, k3, k4 = jax.random.split(key, 4)

    N, C, H, W = 2, 4, 16, 16           # input NCHW
    embed_dim = 2 * C                   # cat of 4 slices = 2*embed_dim = 4*C

    x = jax.random.normal(k1, (N, C, H, W), dtype=jnp.float32)
    gamma = 1.0 + 0.1 * jax.random.normal(k2, (2 * embed_dim,), dtype=jnp.float32)
    beta = 0.1 * jax.random.normal(k3, (2 * embed_dim,), dtype=jnp.float32)
    weight = 0.05 * jax.random.normal(
        k4, (embed_dim, 2 * embed_dim), dtype=jnp.float32
    )  # nn.Linear(2E, E).weight shape = [E, 2E]

    out, h, w = patch_merging(x, gamma, beta, weight)
    out = jax.block_until_ready(out)

    ref, rh, rw = _reference(x, gamma, beta, weight)
    assert out.shape == (N, (H // 2) * (W // 2), embed_dim)
    assert (h, w) == (rh, rw) == (H // 2, W // 2)
    assert jnp.allclose(out, ref, atol=1e-4, rtol=1e-4)

    print("KERNEL_OK")
</pallas_src>

<mosaic_0001>
module attributes {stable_mosaic.version = 11 : i64} {
  func.func @_ln_proj_kernel(%arg0: i32, %arg1: memref<64x16xf32, #tpu.memory_space<vmem>>, %arg2: memref<16x128xf32, #tpu.memory_space<vmem>>, %arg3: memref<1x128xf32, #tpu.memory_space<vmem>>, %arg4: memref<64x128xf32, #tpu.memory_space<vmem>>) attributes {dimension_semantics = [#tpu.dimension_semantics<parallel>], iteration_bounds = array<i64: 2>, scalar_prefetch = 0 : i64, scratch_operands = 0 : i64, tpu.core_type = #tpu.core_type<tc>, window_params = [{transform_indices = @transform_0, window_bounds = array<i64: 64, 16>}, {pipeline_mode = #tpu.pipeline_mode<synchronous>, transform_indices = @transform_1, window_bounds = array<i64: 16, 128>}, {pipeline_mode = #tpu.pipeline_mode<synchronous>, transform_indices = @transform_2, window_bounds = array<i64: 1, 128>}, {transform_indices = @transform_3, window_bounds = array<i64: 64, 128>}]} {
    %c0 = arith.constant 0 : index
    %c0_0 = arith.constant 0 : index
    %0 = vector.load %arg1[%c0, %c0_0] : memref<64x16xf32, #tpu.memory_space<vmem>>, vector<64x16xf32>
    %cst = arith.constant dense<0.000000e+00> : vector<64xf32>
    %1 = vector.multi_reduction <add>, %0, %cst [1] : vector<64x16xf32> to vector<64xf32>
    %2 = vector.shape_cast %1 : vector<64xf32> to vector<64x1xf32>
    %3 = arith.mulf %0, %0 : vector<64x16xf32>
    %cst_1 = arith.constant dense<0.000000e+00> : vector<64xf32>
    %4 = vector.multi_reduction <add>, %3, %cst_1 [1] : vector<64x16xf32> to vector<64xf32>
    %5 = vector.shape_cast %4 : vector<64xf32> to vector<64x1xf32>
    %cst_2 = arith.constant 6.250000e-02 : f32
    %6 = vector.broadcast %cst_2 : f32 to vector<64x1xf32>
    %7 = arith.mulf %2, %6 : vector<64x1xf32>
    %cst_3 = arith.constant 6.250000e-02 : f32
    %8 = vector.broadcast %cst_3 : f32 to vector<64x1xf32>
    %9 = arith.mulf %5, %8 : vector<64x1xf32>
    %10 = arith.mulf %7, %7 : vector<64x1xf32>
    %11 = arith.subf %9, %10 : vector<64x1xf32>
    %cst_4 = arith.constant 0.000000e+00 : f32
    %12 = vector.broadcast %cst_4 : f32 to vector<64x1xf32>
    %13 = arith.maximumf %11, %12 : vector<64x1xf32>
    %14 = vector.broadcast %7 : vector<64x1xf32> to vector<64x16xf32>
    %15 = arith.subf %0, %14 : vector<64x16xf32>
    %cst_5 = arith.constant 9.99999974E-6 : f32
    %16 = vector.broadcast %cst_5 : f32 to vector<64x1xf32>
    %17 = arith.addf %13, %16 : vector<64x1xf32>
    %18 = math.rsqrt %17 : vector<64x1xf32>
    %19 = vector.broadcast %18 : vector<64x1xf32> to vector<64x16xf32>
    %20 = arith.mulf %15, %19 : vector<64x16xf32>
    %c0_6 = arith.constant 0 : index
    %c0_7 = arith.constant 0 : index
    %21 = vector.load %arg2[%c0_6, %c0_7] : memref<16x128xf32, #tpu.memory_space<vmem>>, vector<16x128xf32>
    %cst_8 = arith.constant dense<0.000000e+00> : vector<64x128xf32>
    %22 = tpu.matmul %20, %21, %cst_8 {dimension_numbers = #tpu.dot_dimension_numbers<[1], [0], [0], [1], [0, 0, 1, 1], [], []>} : vector<64x16xf32>, vector<16x128xf32>, vector<64x128xf32> -> vector<64x128xf32>
    %c0_9 = arith.constant 0 : index
    %c0_10 = arith.constant 0 : index
    %23 = vector.load %arg3[%c0_9, %c0_10] : memref<1x128xf32, #tpu.memory_space<vmem>>, vector<1x128xf32>
    %24 = vector.broadcast %23 : vector<1x128xf32> to vector<64x128xf32>
    %25 = arith.addf %22, %24 : vector<64x128xf32>
    %c0_11 = arith.constant 0 : index
    %c0_12 = arith.constant 0 : index
    %26 = vector.load %arg4[%c0_11, %c0_12] : memref<64x128xf32, #tpu.memory_space<vmem>>, vector<64x128xf32>
    tpu.vector_store %arg4[%c0_11, %c0_12], %25 {strides = array<i32>} : memref<64x128xf32, #tpu.memory_space<vmem>>, vector<64x128xf32>,
    return
  }
  func.func @transform_0(%arg0: i32) -> (i32, i32) {
    %c0_i32 = arith.constant 0 : i32
    %c0_i32_0 = arith.constant 0 : i32
    return %arg0, %c0_i32 : i32, i32
  }
  func.func @transform_1(%arg0: i32) -> (i32, i32) {
    %c0_i32 = arith.constant 0 : i32
    %c0_i32_0 = arith.constant 0 : i32
    %c0_i32_1 = arith.constant 0 : i32
    return %c0_i32, %c0_i32_0 : i32, i32
  }
  func.func @transform_2(%arg0: i32) -> (i32, i32) {
    %c0_i32 = arith.constant 0 : i32
    %c0_i32_0 = arith.constant 0 : i32
    %c0_i32_1 = arith.constant 0 : i32
    return %c0_i32, %c0_i32_0 : i32, i32
  }
  func.func @transform_3(%arg0: i32) -> (i32, i32) {
    %c0_i32 = arith.constant 0 : i32
    %c0_i32_0 = arith.constant 0 : i32
    return %arg0, %c0_i32 : i32, i32
  }
}

</mosaic_0001>

<bundles_post_ra>
// kernel: tpu_custom_call.1
= control target key start
LH: loop header
LB: loop body
LE: loop exit
PB: predicated region body
PF: predicated region fallthrough
CT: control target
= control target key end

     0   :  { %8 = vsyncpa [#allocation3], 0  ;;  %s931_s0 = inlined_call_operand.vmem [shape: f32[128,16], index: 0, kind: input, shape index: {}]   ;;  %s932_s1 = inlined_call_operand.vmem [shape: f32[16,128], index: 1, kind: input, shape index: {}]   ;;  %s933_s2 = inlined_call_operand.vmem [shape: f32[1,128], index: 2, kind: input, shape index: {}]   ;;  %s934_s3 = inlined_call_operand.hbm [shape: f32[128,128], index: 3, kind: output, shape index: {}]  }
   0x1   :  { %10 = vsyncpa [#allocation3 + $0x1], 0  ;;  %s725_s12 = smov 0   ;;  %s727_s13 = smov 0  }
   0x2   :  { %s729_s14 = smov 0   ;;  %s731_s15 = smov 0  }
   0x3 LB: > { %s746_s16 = sadd.s32 4294967295, %s700_s15   ;;  %s531_s17 = sadd.s32 4294967294, %s700_s15   ;;  %s700_s15 = sphi %s731_s15, %s940_s15   ;;  %s696_s14 = sphi %s729_s14, %s939_s14   ;;  %s692_s13 = sphi %s727_s13, %s938_s13   ;;  %s688_s12 = sphi %s725_s12, %s937_s12  }
   0x4   : > { %s750_s18 = sadd.s32 1, %s700_s15   ;;  %s91_s19 = sadd.s32 1, %s696_s14 }
   0x5   : > { %s88_s20 = ssub.s32 %s700_s15, %s750_s18  ;;  %p101_p0 = scmp.ne.s32.totalorder %s696_s14, %s692_s13 }
   0x6   : > { %p89_p1 = scmp.eq.s32.totalorder %s88_s20, 0  ;;  %p102_p2 = scmp.eq.s32.totalorder %s746_s16, 1 }
   0x7   : > { %p107_p3 = scmp.ne.s32.totalorder %s692_s13, %s688_s12  ;;  %p108_p4 = scmp.eq.s32.totalorder %s531_s17, 1 }
   0x8   : > { %s761_s21 = scalar_select %p89_p1, %s696_s14, %s91_s19  }
   0x9   : > { %p763_p5 = por %p102_p2, %p101_p0  ;;  %p767_p6 = por %p108_p4, %p107_p3 }
   0xa   : > { %p534_p7 = scmp.ge.s32.totalorder %s700_s15, 1  ;;  %p141_p8 = scmp.lt.s32.totalorder %s700_s15, 3 }
   0xc   : > { %p142_p9 = pnand %p534_p7, %p141_p8 }
   0xd   : > { %s536_s24 = sshll.u32 (!%p142_p9), %s746_s16, 3  ;;  %s162_s6 = sand.u32 (!%p142_p9), 1, %s692_s13  }
   0xe   : > { %145 = sbr.rel (%p142_p9) target bundleno = 426 (0x1aa), region = 32  ;;  %p166_p10 = scmp.lt.s32.totalorder (!%p142_p9), %s536_s24, 15 }
   0xf   : > { %s535_s7 = sshll.u32 (!%p142_p9), %s162_s6, 6  ;;  %s552_s11 = sshll.u32 (!%p142_p9), %s746_s16, 10 }
  0x10   : > { %s164_s10 = scalar_lea.vmem (!%p142_p9), [#allocation2], %s535_s7  ;;  %s891_s16 = scalar_lea.sflag (!%p142_p9), [#allocation3], %s162_s6 }
  0x11   : > { %s469_s17 = sshll.u32 (!%p142_p9), %s164_s10, 4  ;;  %s702_s26 = smov (!%p142_p9), [#allocation2]   ;;  %s887_s17 = int_to_ptr.vmem [resolvable:$true] %s469_s17 }
  0x12   : > { %s644_s27 = sshll.u32 (!%p142_p9), %s702_s26, 4  ;;  %s645_s27 = int_to_ptr.vmem [resolvable:$false] %s644_s27 }
  0x13   : > { %s942_s24 = smov (!%p166_p10, %s536_s24), 15  ;;  %vm180_vm0 = vcmask 130048   ;;  %v310_v32 = vld [vmem:[%s932_s1 + $0x8] sm:$0xff]  ;;  %v309_v33 = vld [vmem:[%s932_s1] sm:$0xff]  ;;  %p647_p0 = scmp.lt.s32.totalorder %s887_s17, %s645_s27 }
  0x14   : > { %s537_s25 = sshll.u32 %s942_s24, 3  ;;  %563 = vmatprep.subr.mxu0 %v310_v32  ;;  %579 = vmatprep.subr.mxu1 %v310_v32  ;;  %s885_s24 = scalar_lea.hbm %s934_s3, %s552_s11 }
  0x15   : > { %s169_s28 = scalar_lea.vmem %s931_s0, %s537_s25  ;;  %564 = vmatpush3.msra.mxu0 %v310_v32  ;;  %581 = vmatpush3.msra.mxu1 %v310_v32  ;;  %s640_s25 = scalar_lea.vmem %s887_s17, 1024 }
  0x16   : > { %v777_v0 = vld [vmem:[%s169_s28 + $0x8] sm:$0xff]  ;;  %v779_v1 = vld [vmem:[%s169_s28] sm:$0xff]  ;;  %v805_v16 = vld [vmem:[%s169_s28 + $0x30] sm:$0xff]  ;;  %565 = vmatprep.subr.mxu0 %v309_v33  ;;  %580 = vmatprep.subr.mxu1 %v309_v33  ;;  %p641_p11 = scmp.ne.s32.totalorder %s887_s17, %s640_s25 }
  0x17   : > { %v781_v2 = vld [vmem:[%s169_s28 + $0x28] sm:$0xff]  ;;  %v184_v3 = vsel %vm180_vm0, %v777_v0, 0.0  ;;  %v181_v4 = vsel %vm180_vm0, %v779_v1, 0.0  ;;  %v787_v5 = vld [vmem:[%s169_s28 + $0x20] sm:$0xff]  ;;  %v205_v9 = vmul.f32 %v779_v1, %v779_v1  ;;  %v206_v13 = vmul.f32 %v777_v0, %v777_v0  ;;  %v807_v17 = vld [vmem:[%s169_s28 + $0x10] sm:$0xff]  ;;  %566 = vmatpush3.msra.mxu0 %v309_v33  ;;  %582 = vmatpush3.msra.mxu1 %v309_v33 }
  0x18   : > { %185 = vadd.xlane.f32.xlu1 %v184_v3  ;;  %182 = vadd.xlane.f32.xlu0 %v181_v4  ;;  %v196_v6 = vsel %vm180_vm0, %v781_v2, 0.0  ;;  %v193_v7 = vsel %vm180_vm0, %v787_v5, 0.0  ;;  %v209_v8 = vmul.f32 %v787_v5, %v787_v5  ;;  %v210_v12 = vmul.f32 %v781_v2, %v781_v2  ;;  %v813_v20 = vld [vmem:[%s169_s28 + $0x38] sm:$0xff]  ;;  %p642_p12 = pnand %p641_p11, %p763_p5 }
  0x19   : > { %v213_v11 = vsel %vm180_vm0, %v205_v9, 0.0  ;;  %v216_v15 = vsel %vm180_vm0, %v206_v13, 0.0  ;;  %v199_v18 = vsel %vm180_vm0, %v805_v16, 0.0  ;;  %v187_v19 = vsel %vm180_vm0, %v807_v17, 0.0  ;;  %v815_v21 = vld [vmem:[%s169_s28 + $0x18] sm:$0xff]  ;;  %s646_s28 = scalar_lea.vmem %s645_s27, 2048 }
  0x1a   : > { %v225_v10 = vsel %vm180_vm0, %v209_v8, 0.0  ;;  %v228_v14 = vsel %vm180_vm0, %v210_v12, 0.0  ;;  %v202_v22 = vsel %vm180_vm0, %v813_v20, 0.0  ;;  %v190_v23 = vsel %vm180_vm0, %v815_v21, 0.0  ;;  %p643_p13 = pneg %p642_p12  ;;  %p648_p1 = scmp.lt.s32.totalorder %s646_s28, %s640_s25 }
  0x1b   : > { %v211_v24 = vmul.f32 %v805_v16, %v805_v16  ;;  %v207_v25 = vmul.f32 %v807_v17, %v807_v17  ;;  %v212_v28 = vmul.f32 %v813_v20, %v813_v20  ;;  %v208_v29 = vmul.f32 %v815_v21, %v815_v21 }
  0x1c   : > { %197 = vadd.xlane.f32.xlu1 %v196_v6  ;;  %194 = vadd.xlane.f32.xlu0 %v193_v7  ;;  %p649_p2 = por %p648_p1, %p647_p0 }
  0x1d   : > { %v231_v26 = vsel %vm180_vm0, %v211_v24, 0.0  ;;  %v219_v27 = vsel %vm180_vm0, %v207_v25, 0.0  ;;  %v234_v30 = vsel %vm180_vm0, %v212_v28, 0.0  ;;  %v222_v31 = vsel %vm180_vm0, %v208_v29, 0.0 }
  0x1e   : > { %p650_p3 = pnand %p649_p2, %p643_p13 }
  0x20   : > { %226 = vadd.xlane.f32.xlu1 %v225_v10  ;;  %214 = vadd.xlane.f32.xlu0 %v213_v11 }
  0x24   : > { %229 = vadd.xlane.f32.xlu1 %v228_v14  ;;  %217 = vadd.xlane.f32.xlu0 %v216_v15 }
  0x28   : > { %200 = vadd.xlane.f32.xlu1 %v199_v18  ;;  %188 = vadd.xlane.f32.xlu0 %v187_v19 }
  0x2c   : > { %203 = vadd.xlane.f32.xlu1 %v202_v22  ;;  %191 = vadd.xlane.f32.xlu0 %v190_v23 }
  0x30   : > { %232 = vadd.xlane.f32.xlu1 %v231_v26  ;;  %220 = vadd.xlane.f32.xlu0 %v219_v27 }
  0x34   : > { %235 = vadd.xlane.f32.xlu1 %v234_v30  ;;  %223 = vadd.xlane.f32.xlu0 %v222_v31 }
  0xa1   : > { %v186_v34 = vpop.xlane.xlu1 %185  ;;  %v183_v35 = vpop.xlane.xlu0 %182 }
  0xa2   : > { %v839_v38 = vmul.f32 0.0625, %v183_v35  ;;  %v843_v40 = vmul.f32 0.0625, %v186_v34 }
  0xa4   : > { %v253_v44 = vmul.f32 %v839_v38, %v839_v38  ;;  %v254_v50 = vmul.f32 %v843_v40, %v843_v40  ;;  %v277_v35 = vsub.f32 %v779_v1, %v839_v38  ;;  %v278_v1 = vsub.f32 %v777_v0, %v843_v40 }
  0xa5   : > { %v198_v36 = vpop.xlane.xlu1 %197  ;;  %v195_v37 = vpop.xlane.xlu0 %194 }
  0xa6   : > { %v841_v39 = vmul.f32 0.0625, %v195_v37  ;;  %v845_v41 = vmul.f32 0.0625, %v198_v36 }
  0xa8   : > { %v257_v45 = vmul.f32 %v841_v39, %v841_v39  ;;  %v258_v51 = vmul.f32 %v845_v41, %v845_v41  ;;  %v281_v36 = vsub.f32 %v787_v5, %v841_v39 }
  0xa9   : > { %v227_v42 = vpop.xlane.xlu1 %226  ;;  %v215_v43 = vpop.xlane.xlu0 %214 }
  0xaa   : > { %v249_v46 = vmul.f32 0.0625, %v227_v42  ;;  %v245_v47 = vmul.f32 0.0625, %v215_v43 }
  0xac   : > { %v265_v48 = vsub.f32 %v249_v46, %v257_v45  ;;  %v261_v49 = vsub.f32 %v245_v47, %v253_v44 }
  0xad   : > { %v230_v52 = vpop.xlane.xlu1 %229  ;;  %v218_v53 = vpop.xlane.xlu0 %217 }
  0xae   : > { %v273_v54 = vmax.f32 %v265_v48, 0.0  ;;  %v269_v55 = vmax.f32 %v261_v49, 0.0  ;;  %v250_v56 = vmul.f32 0.0625, %v230_v52  ;;  %v246_v57 = vmul.f32 0.0625, %v218_v53 }
  0xaf   : > { %v282_v48 = vsub.f32 %v781_v2, %v845_v41 }
  0xb0   : > { %v289_v58 = vadd.f32 1e-05, %v273_v54  ;;  %v285_v59 = vadd.f32 1e-05, %v269_v55  ;;  %v266_v60 = vsub.f32 %v250_v56, %v258_v51  ;;  %v262_v61 = vsub.f32 %v246_v57, %v254_v50 }
  0xb1   : > { %v201_v62 = vpop.xlane.xlu1 %200  ;;  %v189_v63 = vpop.xlane.xlu0 %188 }
  0xb2   : > { %624 = vrsqrt.f32 %v289_v58  ;;  %v274_v3 = vmax.f32 %v266_v60, 0.0  ;;  %v270_v4 = vmax.f32 %v262_v61, 0.0  ;;  %v243_v10 = vmul.f32 0.0625, %v201_v62 }
  0xb3   : > { %626 = vrsqrt.f32 %v285_v59  ;;  %v239_v11 = vmul.f32 0.0625, %v189_v63 }
  0xb4   : > { %v290_v6 = vadd.f32 1e-05, %v274_v3  ;;  %v286_v7 = vadd.f32 1e-05, %v270_v4  ;;  %v259_v18 = vmul.f32 %v243_v10, %v243_v10  ;;  %v283_v2 = vsub.f32 %v805_v16, %v243_v10 }
  0xb5   : > { %v204_v8 = vpop.xlane.xlu1 %203  ;;  %v192_v9 = vpop.xlane.xlu0 %191  ;;  %v255_v19 = vmul.f32 %v239_v11, %v239_v11  ;;  %v279_v40 = vsub.f32 %v807_v17, %v239_v11  ;;  %v538_v17 = vld [vmem:[%s933_s2] ss:$0 sm:$0xff] }
  0xb6   : > { %628 = vrsqrt.f32 %v290_v6  ;;  %v244_v12 = vmul.f32 0.0625, %v204_v8  ;;  %v240_v13 = vmul.f32 0.0625, %v192_v9 }
  0xb7   : > { %630 = vrsqrt.f32 %v286_v7 }
  0xb8   : > { %v260_v26 = vmul.f32 %v244_v12, %v244_v12  ;;  %v256_v27 = vmul.f32 %v240_v13, %v240_v13  ;;  %v284_v56 = vsub.f32 %v813_v20, %v244_v12  ;;  %v280_v58 = vsub.f32 %v815_v21, %v240_v13 }
  0xb9   : > { %v233_v14 = vpop.xlane.xlu1 %232  ;;  %v221_v15 = vpop.xlane.xlu0 %220 }
  0xba   : > { %v251_v22 = vmul.f32 0.0625, %v233_v14  ;;  %v247_v23 = vmul.f32 0.0625, %v221_v15 }
  0xbc   : > { %v267_v24 = vsub.f32 %v251_v22, %v259_v18  ;;  %v263_v25 = vsub.f32 %v247_v23, %v255_v19 }
  0xbd   : > { %v236_v28 = vpop.xlane.xlu1 %235  ;;  %v224_v29 = vpop.xlane.xlu0 %223 }
  0xbe   : > { %v275_v30 = vmax.f32 %v267_v24, 0.0  ;;  %v271_v31 = vmax.f32 %v263_v25, 0.0  ;;  %v252_v32 = vmul.f32 0.0625, %v236_v28  ;;  %v248_v33 = vmul.f32 0.0625, %v224_v29 }
  0xbf   : > { %v625_v34 = vpop.eup %624 }
  0xc0   : > { %v627_v37 = vpop.eup %626  ;;  %v291_v42 = vadd.f32 1e-05, %v275_v30  ;;  %v287_v43 = vadd.f32 1e-05, %v271_v31  ;;  %v268_v44 = vsub.f32 %v252_v32, %v260_v26  ;;  %v264_v45 = vsub.f32 %v248_v33, %v256_v27 }
  0xc1   : > { %v301_v46 = vmul.f32 %v627_v37, %v277_v35  ;;  %v305_v47 = vmul.f32 %v625_v34, %v281_v36 }
  0xc2   : > { %632 = vrsqrt.f32 %v291_v42  ;;  %v276_v49 = vmax.f32 %v268_v44, 0.0  ;;  %v272_v50 = vmax.f32 %v264_v45, 0.0 }
  0xc3   : > { %v629_v51 = vpop.eup %628  ;;  %634 = vrsqrt.f32 %v287_v43  ;;  %567 = vmatprep.mubr.msk.f32.mxu0 %vm180_vm0, %v301_v46  ;;  %573 = vmatprep.mubr.msk.f32.mxu1 %vm180_vm0, %v305_v47 }
  0xc4   : > { %v631_v5 = vpop.eup %630  ;;  %v292_v38 = vadd.f32 1e-05, %v276_v49  ;;  %v288_v39 = vadd.f32 1e-05, %v272_v50  ;;  %v306_v52 = vmul.f32 %v629_v51, %v282_v48 }
  0xc5   : > { %v302_v53 = vmul.f32 %v631_v5, %v278_v1 }
  0xc6   : > { %636 = vrsqrt.f32 %v292_v38  ;;  %574 = vmatmul.mubr.msk.f32.vlgmr.msra.gmra.mxu1 %vm180_vm0, %v306_v52 }
  0xc7   : > { %638 = vrsqrt.f32 %v288_v39  ;;  %568 = vmatmul.mubr.msk.f32.vlgmr.msra.gmra.mxu0 %vm180_vm0, %v302_v53 }
  0xcf   : > { %v633_v0 = vpop.eup %632 }
  0xd0   : > { %v635_v41 = vpop.eup %634  ;;  %v307_v54 = vmul.f32 %v633_v0, %v283_v2 }
  0xd1   : > { %v303_v55 = vmul.f32 %v635_v41, %v279_v40 }
  0xd2   : > { %576 = vmatprep.mubr.msk.f32.mxu1 %vm180_vm0, %v307_v54 }
  0xd3   : > { %v637_v57 = vpop.eup %636  ;;  %570 = vmatprep.mubr.msk.f32.mxu0 %vm180_vm0, %v303_v55 }
  0xd4   : > { %v639_v59 = vpop.eup %638  ;;  %v308_v60 = vmul.f32 %v637_v57, %v284_v56 }
  0xd5   : > { %v304_v16 = vmul.f32 %v639_v59, %v280_v58 }
  0xd6   : > { %577 = vmatmul.mubr.msk.f32.gmra.mxu1 %vm180_vm0, %v308_v60 }
  0xd7   : > { %571 = vmatmul.mubr.msk.f32.gmra.mxu0 %vm180_vm0, %v304_v16 }
 0x186   : > { %v575_v20 = vpop.f32.mrf.mxu1 }
 0x187   : > { %v569_v61 = vpop.f32.mrf.mxu0  ;;  %v434_v21 = vadd.f32 %v575_v20, %v538_v17 }
 0x188   : > { %v414_v62 = vadd.f32 %v569_v61, %v538_v17  ;;  %v428_v63 = vpop.f32.mrf.mxu1 }
 0x189   : > { %452 = vst [vmem:[%s164_s10 + $0x28] sm:$0xff] %v434_v21  ;;  %v408_v3 = vpop.f32.mrf.mxu0  ;;  %v429_v4 = vadd.f32 %v538_v17, %v428_v63 }
 0x18a   : > { %448 = vst [vmem:[%s164_s10 + $0x8] sm:$0xff] %v414_v62  ;;  %v409_v6 = vadd.f32 %v538_v17, %v408_v3 }
 0x18b   : > { %451 = vst [vmem:[%s164_s10 + $0x20] sm:$0xff] %v429_v4 }
 0x18c   : > { %447 = vst [vmem:[%s164_s10] sm:$0xff] %v409_v6 }
 0x196   : > { %v578_v7 = vpop.f32.mrf.mxu1 }
 0x197   : > { %v572_v8 = vpop.f32.mrf.mxu0  ;;  %v444_v9 = vadd.f32 %v578_v7, %v538_v17 }
 0x198   : > { %v424_v10 = vadd.f32 %v572_v8, %v538_v17  ;;  %v438_v11 = vpop.f32.mrf.mxu1 }
 0x199   : > { %454 = vst [vmem:[%s164_s10 + $0x38] sm:$0xff] %v444_v9  ;;  %v418_v12 = vpop.f32.mrf.mxu0  ;;  %v439_v13 = vadd.f32 %v538_v17, %v438_v11 }
 0x19a   : > { %450 = vst [vmem:[%s164_s10 + $0x18] sm:$0xff] %v424_v10  ;;  %v419_v14 = vadd.f32 %v538_v17, %v418_v12 }
 0x19b   : > { %453 = vst [vmem:[%s164_s10 + $0x30] sm:$0xff] %v439_v13 }
 0x19c   : > { %449 = vst [vmem:[%s164_s10 + $0x10] sm:$0xff] %v419_v14 }
 0x19d   : > { %653 = shalt.err (!%p650_p3)
}
 0x19e   : > { %s654_s29 = scalar_lea.hbm %s885_s24, 1024  ;;  %s658_s5 = scalar_lea.hbm %s934_s3, 2048 }
 0x19f   : > { %p655_p4 = scmp.ne.s32.totalorder %s885_s24, %s654_s29  ;;  %p659_p9 = scmp.lt.s32.totalorder %s885_s24, %s934_s3 }
 0x1a0   : > { %p660_p10 = scmp.lt.s32.totalorder %s658_s5, %s654_s29 }
 0x1a1   : > { %p656_p7 = pnand %p655_p4, %p763_p5 }
 0x1a2   : > { %p661_p11 = por %p660_p10, %p659_p9 }
 0x1a3   : > { %p657_p8 = pneg %p656_p7 }
 0x1a5   : > { %p662_p12 = pnand %p661_p11, %p657_p8 }
 0x1a7   : > { %665 = shalt.err (!%p662_p12)
}
 0x1a8   : > { %s703_s8 = smov 128   ;;  %s704_s9 = smov 8  }
 0x1a9   : > { %583 = dma.vmem_to_hbm [thread:$0]  (%p763_p5), %s887_s17, 1024, %s885_s24, %s891_s16, %s703_s8, %s703_s8, %s704_s9  }
 0x1aa PF: > { %p589_p13 = scmp.ge.s32.totalorder %s700_s15, 2  ;;  %s484_s10 = sand.u32 1, %s688_s12  }
 0x1ab   : > { %s485_s11 = scalar_lea.sflag [#allocation3], %s484_s10 }
 0x1ac   : > { %p586_p0 = pnand %p589_p13, %p767_p6 }
 0x1ae   : > { %p587_p1 = pneg %p586_p0 }
 0x1b0   : > { %683 = dma.done.wait (%p587_p1), %s485_s11, 1024  }
 0x1b1   : > { %685 = vsyncadd (%p587_p1), %s485_s11, 4294966272  ;;  %p13_p2 = scmp.ge.s32.totalorder %s750_s18, 4   ;;  %s937_s12 = smov %s692_s13 }
 0x1b2   : > { %s938_s13 = smov %s696_s14  ;;  %s939_s14 = smov %s761_s21 }
 0x1b3   : > { %s940_s15 = smov %s750_s18  ;;  %15 = sbr.rel (!%p13_p2) target bundleno = 3 (0x3), region = 67 }
 0x1b8   :  { %490 = vsyncpa [#allocation3], 1 }
 0x1b9   :  { %492 = vsyncpa [#allocation3 + $0x1], 1 }

</bundles_post_ra>
